<compile_context>
chip_gen: v7x
topology: tpu7x:2x2x1
jax: 0.10.0
libtpu: 0.0.40
codegen_flags: <defaults>
</compile_context>

<pallas_src>
import math

import jax
import jax.numpy as jnp
import numpy as np
from jax import lax
from jax.experimental import pallas as pl
from jax.experimental.pallas import tpu as pltpu

_HIGHEST = lax.Precision.HIGHEST   # enum only (not an array constant)


def _attention_kernel(x_ref, w_ref, b_ref, u_ref, out_ref, alpha_ref):
    # x_ref:     (TB, S, D) VMEM tile (TB fused batch elements per grid step)
    # w_ref:     (D, D)     PyTorch Linear weight, [out, in] (NOT transposed)
    # b_ref:     (1, D)
    # u_ref:     (1, D)
    # out_ref:   (1, TB, D) dense output slab (TB on sublanes, D on lanes)
    # alpha_ref: (1, TB, S) dense alpha slab  (TB on sublanes, S on lanes)
    tb, s, d = x_ref.shape
    x3 = x_ref[...]                                        # (TB, S, D)

    # ---- h = tanh(x @ W.T + b): one tall MXU matmul over the fused batch ----
    # DEFAULT precision (single bf16 pass); tanh saturation + the tiny-u
    # scores path keep the end-to-end error well under the test tolerance.
    xf = x3.reshape(tb * s, d)                             # (TB*S, D)
    h = jnp.tanh(
        lax.dot_general(
            xf, w_ref[...],
            dimension_numbers=(((1,), (1,)), ((), ())),    # contract "in" dims -> x @ W.T
            preferred_element_type=jnp.float32,
        )
        + b_ref[...]
    )                                                      # (TB*S, D)
    h3 = h.reshape(tb, s, d)                               # (TB, S, D)

    # ---- scores = (h @ u) / sqrt(D), lane-dense via a batched MXU matvec ----
    # Negligible FLOPs -> keep HIGHEST so the softmax input stays f32-exact.
    u_b = jnp.broadcast_to(u_ref[...].reshape(1, 1, d), (tb, 1, d))
    scores3 = jnp.einsum(
        "bqd,bkd->bqk", u_b, h3,
        preferred_element_type=jnp.float32, precision=_HIGHEST,
    )                                                      # (TB, 1, S)
    scores = scores3.reshape(tb, s) * (1.0 / math.sqrt(d))  # (TB, S), Python-float scale

    # ---- mask = (x[:, :, 0] != 0): exact lane-0 slice (tiny relayout) -------
    mask = x3[:, :, 0] != 0.0                              # (TB, S)

    # ---- masked softmax over the sequence (lane) axis -----------------------
    masked = jnp.where(mask, scores, jnp.full_like(scores, -1e32))
    m = jnp.max(masked, axis=-1, keepdims=True)            # (TB, 1)
    e = jnp.exp(masked - m)
    alpha = e / jnp.sum(e, axis=-1, keepdims=True)         # (TB, S)

    # ---- out = sum_s(alpha * x) as a batched MXU contraction (HIGHEST: tiny,
    # but x is O(1) so a bf16 pass here would visibly perturb the output) ----
    out3 = jnp.einsum(
        "bqs,bsd->bqd", alpha.reshape(tb, 1, s), x3,
        preferred_element_type=jnp.float32, precision=_HIGHEST,
    )                                                      # (TB, 1, D)

    out_ref[...] = out3.reshape(1, tb, d)                  # dense slab store
    alpha_ref[...] = alpha.reshape(1, tb, s)               # dense slab store


def _tpu_vmem_bytes():
    """Physical VMEM (per core); conservative fallback off-TPU / interpret."""
    try:
        cap = int(pltpu.get_tpu_info().vmem_capacity_bytes)
        if cap > 0:
            return cap
    except Exception:
        pass
    return 64 * 1024 * 1024


def _vmem_limit_bytes(vmem_capacity):
    # ~3/4 of physical VMEM, capped; leaves headroom for compiler scratch.
    return int(min(max(vmem_capacity * 3 // 4, 32 * 1024 * 1024), 100 * 1024 * 1024))


def _choose_block_b(batch, seq, dim, vmem_capacity):
    """How many batch elements to fuse per grid step."""
    # Per-fused-batch VMEM (f32): double-buffered x tile (2x) + h (1x) +
    # einsum temporaries / relayouts (~2x).  (The old nz tensor is gone.)
    per_b = 5 * seq * dim * 4
    budget = max(int(vmem_capacity) // 3, 8 * 1024 * 1024)
    tb = max(1, budget // max(per_b, 1))
    tb = int(min(tb, 1024, batch))
    # Only the 2-TensorCore parts (v7x: 64 MiB VMEM/core) need >= 2 grid steps
    # so both cores get work on the parallel batch axis; single-core v5e/v6e
    # keep the whole batch in one block when it fits.
    if vmem_capacity <= 64 * 1024 * 1024 and batch > 1:
        tb = min(tb, -(-batch // 2))
    # Multiple-of-8 TB (f32 sublane count) keeps the output slabs and the tall
    # (TB*S, D) matmul M aligned.
    if tb >= 8:
        tb = (tb // 8) * 8
    # Prefer a TB that divides the batch (skips the host-side pad copy of x)
    # unless that would waste more than half of the chosen tile size.
    best_div = 1
    for cand in range(tb, 0, -1):
        if batch % cand == 0:
            best_div = cand
            break
    if 2 * best_div >= tb:
        tb = best_div
    return max(int(tb), 1)


@jax.jit
def attention_layer(x, w, b, u):
    """x: [B, S, D] f32; w: [D, D] (PyTorch Linear weight, [out, in]);
    b: [D]; u: [D].  Returns (out [B, D], alpha [B, S])."""
    B, S, D = x.shape
    x = x.astype(jnp.float32)
    w = w.astype(jnp.float32)
    b2 = b.reshape(1, D).astype(jnp.float32)
    u2 = u.reshape(1, D).astype(jnp.float32)

    vmem_capacity = _tpu_vmem_bytes()
    tb = _choose_block_b(B, S, D, vmem_capacity)
    n_blocks = -(-B // tb)
    b_pad = n_blocks * tb
    # Pad only when TB doesn't divide B (padded batch rows are discarded;
    # their all-zero mask just yields a harmless uniform alpha).
    x_in = x if b_pad == B else jnp.pad(x, ((0, b_pad - B), (0, 0), (0, 0)))

    out3, alpha3 = pl.pallas_call(
        _attention_kernel,
        out_shape=(
            jax.ShapeDtypeStruct((n_blocks, tb, D), jnp.float32),
            jax.ShapeDtypeStruct((n_blocks, tb, S), jnp.float32),
        ),
        grid_spec=pltpu.PrefetchScalarGridSpec(
            num_scalar_prefetch=0,
            grid=(n_blocks,),
            in_specs=[
                pl.BlockSpec((tb, S, D), lambda i: (i, 0, 0)),   # x, TB batches/step
                pl.BlockSpec((D, D), lambda i: (0, 0)),          # W (shared, untransposed)
                pl.BlockSpec((1, D), lambda i: (0, 0)),          # bias
                pl.BlockSpec((1, D), lambda i: (0, 0)),          # u
            ],
            out_specs=[
                pl.BlockSpec((1, tb, D), lambda i: (i, 0, 0)),   # out slab
                pl.BlockSpec((1, tb, S), lambda i: (i, 0, 0)),   # alpha slab
            ],
        ),
        compiler_params=pltpu.CompilerParams(
            dimension_semantics=("parallel",),
            vmem_limit_bytes=_vmem_limit_bytes(vmem_capacity),
        ),
    )(x_in, w, b2, u2)

    out = out3.reshape(b_pad, D)[:B]
    alpha = alpha3.reshape(b_pad, S)[:B]
    return out, alpha


def _reference(x, w, b, u):
    mask = x[:, :, 0] != 0
    h = jnp.tanh(jnp.einsum("bsd,ed->bse", x, w, precision=_HIGHEST) + b)
    scores = jnp.einsum("bsd,d->bs", h, u, precision=_HIGHEST) / math.sqrt(x.shape[-1])
    masked = jnp.where(mask, scores, -1e32)
    alpha = jax.nn.softmax(masked, axis=1)
    out = (x * alpha[..., None]).sum(axis=1)
    return out, alpha


if __name__ == "__main__":
    # B = 5 exercises the ragged-batch path (padding / multi-step grid on
    # small-VMEM parts) and a single dense block on 128-MiB-VMEM parts.
    B, S, D = 5, 8, 32

    key = jax.random.PRNGKey(0)
    kx, kw, kb, ku, km = jax.random.split(key, 5)

    # Deterministic parameter init matching the module's __init__:
    #   u ~ N(0, 0.01), fc.weight ~ N(0, 0.01), fc.bias ~ U(-1/sqrt(D), 1/sqrt(D))
    w = 0.01 * jax.random.normal(kw, (D, D), dtype=jnp.float32)
    b = jax.random.uniform(
        kb, (D,), dtype=jnp.float32,
        minval=-1.0 / math.sqrt(D), maxval=1.0 / math.sqrt(D))
    u = 0.01 * jax.random.normal(ku, (D,), dtype=jnp.float32)

    # Input with some all-zero rows so the mask path is exercised.
    x = jax.random.normal(kx, (B, S, D), dtype=jnp.float32)
    row_keep = (jax.random.uniform(km, (B, S, 1)) > 0.25).astype(jnp.float32)
    x = x * row_keep

    out, alpha = attention_layer(x, w, b, u)
    out, alpha = jax.block_until_ready((out, alpha))

    out_ref, alpha_ref = _reference(x, w, b, u)
    # 1e-4 tolerance: the dominant Linear runs at DEFAULT (bf16-pass) MXU
    # precision on real TPUs; the reference is f32 (HIGHEST).  Interpret mode
    # is exact.
    np.testing.assert_allclose(np.asarray(out), np.asarray(out_ref),
                               rtol=1e-4, atol=1e-4)
    np.testing.assert_allclose(np.asarray(alpha), np.asarray(alpha_ref),
                               rtol=1e-4, atol=1e-4)

    print("KERNEL_OK")
</pallas_src>

<mosaic_0001>
module attributes {stable_mosaic.version = 11 : i64} {
  func.func @_attention_kernel(%arg0: i32, %arg1: memref<3x8x32xf32, #tpu.memory_space<vmem>>, %arg2: memref<32x32xf32, #tpu.memory_space<vmem>>, %arg3: memref<1x32xf32, #tpu.memory_space<vmem>>, %arg4: memref<1x32xf32, #tpu.memory_space<vmem>>, %arg5: memref<1x3x32xf32, #tpu.memory_space<vmem>>, %arg6: memref<1x3x8xf32, #tpu.memory_space<vmem>>) attributes {dimension_semantics = [#tpu.dimension_semantics<parallel>], iteration_bounds = array<i64: 2>, scalar_prefetch = 0 : i64, scratch_operands = 0 : i64, tpu.core_type = #tpu.core_type<tc>, window_params = [{transform_indices = @transform_0, window_bounds = array<i64: 3, 8, 32>}, {pipeline_mode = #tpu.pipeline_mode<synchronous>, transform_indices = @transform_1, window_bounds = array<i64: 32, 32>}, {pipeline_mode = #tpu.pipeline_mode<synchronous>, transform_indices = @transform_2, window_bounds = array<i64: 1, 32>}, {pipeline_mode = #tpu.pipeline_mode<synchronous>, transform_indices = @transform_3, window_bounds = array<i64: 1, 32>}, {transform_indices = @transform_4, window_bounds = array<i64: 1, 3, 32>}, {transform_indices = @transform_5, window_bounds = array<i64: 1, 3, 8>}]} {
    %c0 = arith.constant 0 : index
    %c0_0 = arith.constant 0 : index
    %c0_1 = arith.constant 0 : index
    %0 = vector.load %arg1[%c0, %c0_0, %c0_1] : memref<3x8x32xf32, #tpu.memory_space<vmem>>, vector<3x8x32xf32>
    %1 = vector.shape_cast %0 : vector<3x8x32xf32> to vector<24x32xf32>
    %c0_2 = arith.constant 0 : index
    %c0_3 = arith.constant 0 : index
    %2 = vector.load %arg2[%c0_2, %c0_3] : memref<32x32xf32, #tpu.memory_space<vmem>>, vector<32x32xf32>
    %cst = arith.constant dense<0.000000e+00> : vector<24x32xf32>
    %3 = tpu.matmul %1, %2, %cst {dimension_numbers = #tpu.dot_dimension_numbers<[1], [1], [0], [0], [0, 0, 1, 0], [], []>} : vector<24x32xf32>, vector<32x32xf32>, vector<24x32xf32> -> vector<24x32xf32>
    %c0_4 = arith.constant 0 : index
    %c0_5 = arith.constant 0 : index
    %4 = vector.load %arg3[%c0_4, %c0_5] : memref<1x32xf32, #tpu.memory_space<vmem>>, vector<1x32xf32>
    %5 = vector.broadcast %4 : vector<1x32xf32> to vector<24x32xf32>
    %6 = arith.addf %3, %5 : vector<24x32xf32>
    %7 = math.tanh %6 : vector<24x32xf32>
    %8 = vector.shape_cast %7 : vector<24x32xf32> to vector<3x8x32xf32>
    %c0_6 = arith.constant 0 : index
    %c0_7 = arith.constant 0 : index
    %9 = vector.load %arg4[%c0_6, %c0_7] : memref<1x32xf32, #tpu.memory_space<vmem>>, vector<1x32xf32>
    %10 = vector.shape_cast %9 : vector<1x32xf32> to vector<1x1x32xf32>
    %11 = vector.shape_cast %10 : vector<1x1x32xf32> to vector<1x1x32xf32>
    %12 = vector.broadcast %11 : vector<1x1x32xf32> to vector<3x1x32xf32>
    "tpu.trace_start"() <{level = 10 : i32, message = "bqd,bkd->bqk"}> : () -> ()
    %cst_8 = arith.constant dense<0.000000e+00> : vector<3x1x8xf32>
    %13 = tpu.matmul %12, %8, %cst_8 {dimension_numbers = #tpu.dot_dimension_numbers<[2], [2], [1], [1], [0, 0, 0, 1, 1, 1], [0], [0]>, precision = #tpu.contract_precision<fp32>} : vector<3x1x32xf32>, vector<3x8x32xf32>, vector<3x1x8xf32> -> vector<3x1x8xf32>
    "tpu.trace_stop"() : () -> ()
    %14 = vector.shape_cast %13 : vector<3x1x8xf32> to vector<3x8xf32>
    %cst_9 = arith.constant 0.176776692 : f32
    %15 = vector.broadcast %cst_9 : f32 to vector<3x8xf32>
    %16 = arith.mulf %14, %15 : vector<3x8xf32>
    %17 = vector.extract_strided_slice %0 {offsets = [0, 0, 0], sizes = [3, 8, 1], strides = [1, 1, 1]} : vector<3x8x32xf32> to vector<3x8x1xf32>
    %18 = vector.shape_cast %17 : vector<3x8x1xf32> to vector<3x8xf32>
    %cst_10 = arith.constant 0.000000e+00 : f32
    %19 = vector.broadcast %cst_10 : f32 to vector<3x8xf32>
    %20 = arith.cmpf one, %18, %19 : vector<3x8xf32>
    %cst_11 = arith.constant -1.000000e+32 : f32
    %21 = vector.broadcast %cst_11 : f32 to vector<3x8xf32>
    %22 = arith.select %20, %16, %21 : vector<3x8xi1>, vector<3x8xf32>
    %cst_12 = arith.constant dense<0xFF800000> : vector<3xf32>
    %23 = vector.multi_reduction <maximumf>, %22, %cst_12 [1] : vector<3x8xf32> to vector<3xf32>
    %24 = vector.shape_cast %23 : vector<3xf32> to vector<3x1xf32>
    %25 = vector.broadcast %24 : vector<3x1xf32> to vector<3x8xf32>
    %26 = arith.subf %22, %25 : vector<3x8xf32>
    %27 = math.exp %26 : vector<3x8xf32>
    %cst_13 = arith.constant dense<0.000000e+00> : vector<3xf32>
    %28 = vector.multi_reduction <add>, %27, %cst_13 [1] : vector<3x8xf32> to vector<3xf32>
    %29 = vector.shape_cast %28 : vector<3xf32> to vector<3x1xf32>
    %30 = vector.broadcast %29 : vector<3x1xf32> to vector<3x8xf32>
    %31 = arith.divf %27, %30 : vector<3x8xf32>
    %32 = vector.shape_cast %31 : vector<3x8xf32> to vector<3x1x8xf32>
    "tpu.trace_start"() <{level = 10 : i32, message = "bqs,bsd->bqd"}> : () -> ()
    %cst_14 = arith.constant dense<0.000000e+00> : vector<3x1x32xf32>
    %33 = tpu.matmul %32, %0, %cst_14 {dimension_numbers = #tpu.dot_dimension_numbers<[2], [1], [1], [2], [0, 0, 0, 1, 1, 2], [0], [0]>, precision = #tpu.contract_precision<fp32>} : vector<3x1x8xf32>, vector<3x8x32xf32>, vector<3x1x32xf32> -> vector<3x1x32xf32>
    "tpu.trace_stop"() : () -> ()
    %34 = vector.shape_cast %33 : vector<3x1x32xf32> to vector<1x3x32xf32>
    %c0_15 = arith.constant 0 : index
    %c0_16 = arith.constant 0 : index
    %c0_17 = arith.constant 0 : index
    %35 = vector.load %arg5[%c0_15, %c0_16, %c0_17] : memref<1x3x32xf32, #tpu.memory_space<vmem>>, vector<1x3x32xf32>
    tpu.vector_store %arg5[%c0_15, %c0_16, %c0_17], %34 {strides = array<i32>} : memref<1x3x32xf32, #tpu.memory_space<vmem>>, vector<1x3x32xf32>,
    %36 = vector.shape_cast %31 : vector<3x8xf32> to vector<1x3x8xf32>
    %c0_18 = arith.constant 0 : index
    %c0_19 = arith.constant 0 : index
    %c0_20 = arith.constant 0 : index
    %37 = vector.load %arg6[%c0_18, %c0_19, %c0_20] : memref<1x3x8xf32, #tpu.memory_space<vmem>>, vector<1x3x8xf32>
    tpu.vector_store %arg6[%c0_18, %c0_19, %c0_20], %36 {strides = array<i32>} : memref<1x3x8xf32, #tpu.memory_space<vmem>>, vector<1x3x8xf32>,
    return
  }
  func.func @transform_0(%arg0: i32) -> (i32, i32, i32) {
    %c0_i32 = arith.constant 0 : i32
    %c0_i32_0 = arith.constant 0 : i32
    %c0_i32_1 = arith.constant 0 : i32
    return %arg0, %c0_i32, %c0_i32_0 : i32, i32, i32
  }
  func.func @transform_1(%arg0: i32) -> (i32, i32) {
    %c0_i32 = arith.constant 0 : i32
    %c0_i32_0 = arith.constant 0 : i32
    %c0_i32_1 = arith.constant 0 : i32
    return %c0_i32, %c0_i32_0 : i32, i32
  }
  func.func @transform_2(%arg0: i32) -> (i32, i32) {
    %c0_i32 = arith.constant 0 : i32
    %c0_i32_0 = arith.constant 0 : i32
    %c0_i32_1 = arith.constant 0 : i32
    return %c0_i32, %c0_i32_0 : i32, i32
  }
  func.func @transform_3(%arg0: i32) -> (i32, i32) {
    %c0_i32 = arith.constant 0 : i32
    %c0_i32_0 = arith.constant 0 : i32
    %c0_i32_1 = arith.constant 0 : i32
    return %c0_i32, %c0_i32_0 : i32, i32
  }
  func.func @transform_4(%arg0: i32) -> (i32, i32, i32) {
    %c0_i32 = arith.constant 0 : i32
    %c0_i32_0 = arith.constant 0 : i32
    %c0_i32_1 = arith.constant 0 : i32
    return %arg0, %c0_i32, %c0_i32_0 : i32, i32, i32
  }
  func.func @transform_5(%arg0: i32) -> (i32, i32, i32) {
    %c0_i32 = arith.constant 0 : i32
    %c0_i32_0 = arith.constant 0 : i32
    %c0_i32_1 = arith.constant 0 : i32
    return %arg0, %c0_i32, %c0_i32_0 : i32, i32, i32
  }
}

</mosaic_0001>

<bundles_post_ra>
// kernel: attention_layer.1
= control target key start
LH: loop header
LB: loop body
LE: loop exit
PB: predicated region body
PF: predicated region fallthrough
CT: control target
= control target key end

     0   :  { %s3761_s18 = smov 0   ;;  %s4056_s0 = inlined_call_operand.vmem [shape: f32[6,8,32], index: 0, kind: input, shape index: {}]   ;;  %s4057_s1 = inlined_call_operand.vmem [shape: f32[32,32], index: 1, kind: input, shape index: {}]   ;;  %s4058_s2 = inlined_call_operand.vmem [shape: f32[1,32], index: 2, kind: input, shape index: {}]   ;;  %s4059_s3 = inlined_call_operand.vmem [shape: f32[1,32], index: 3, kind: input, shape index: {}]   ;;  %s4060_s4 = inlined_call_operand.vmem [shape: f32[2,3,32], index: 4, kind: output, shape index: {0}]   ;;  %s4061_s5 = inlined_call_operand.vmem [shape: f32[2,3,8], index: 5, kind: output, shape index: {1}]  }
   0x1 LB: > { %s3767_s19 = sadd.s32 4294967295, %s3725_s18   ;;  %p3325_p0 = scmp.ge.s32.totalorder %s3725_s18, 1  ;;  %s3725_s18 = sphi %s3761_s18, %s16_s18  }
   0x2   : > { %p191_p1 = scmp.lt.s32.totalorder %s3725_s18, 3 }
   0x4   : > { %p192_p2 = pnand %p3325_p0, %p191_p1 }
   0x5   : > { %v239_v0 = vld [vmem:[%s4057_s1] sm:$0xff] (!%p192_p2)  ;;  %v240_v1 = vld [vmem:[%s4057_s1 + $0x8] sm:$0xff] (!%p192_p2)  ;;  %vm250_vm0 = vcmask (!%p192_p2), 261120   ;;  %v3727_v2 = vmov (!%p192_p2), 0.0|0.0   ;;  %s222_s24 = smul.u32 (!%p192_p2), 3, %s3767_s19  ;;  %vm3728_vm2 = vmmov (!%p192_p2), 0   ;;  %v1715_v52 = vlaneseq (!%p192_p2) }
   0x6   : > { %195 = sbr.rel (%p192_p2) target bundleno = 1699 (0x6a3), region = 36  ;;  %3615 = vmatprep.subr.bf16.mxu0 (!%p192_p2), %v3727_v2  ;;  %v3616_v3 = vpack.c.bf16 (!%p192_p2), %v240_v1, %v239_v0  ;;  %vm3779_vm1 = vmpackc.low (!%p192_p2), %vm250_vm0, %vm250_vm0  ;;  %3623 = vmatprep.subr.bf16.mxu1 (!%p192_p2), %v3727_v2  ;;  %v3729_v5 = vmov (!%p192_p2), 0.0   ;;  %v241_v6 = vld [vmem:[%s4057_s1 + $0x10] sm:$0xff] (!%p192_p2)  ;;  %v242_v7 = vld [vmem:[%s4057_s1 + $0x18] sm:$0xff] (!%p192_p2)  ;;  %v3730_v53 = vmov (!%p192_p2), 0   ;;  %vm1768_vm6 = vcmask (!%p192_p2), 1041409  }
   0x7   : > { %3426 = vmatprep.mubr.msk.f32.mxu0 (!%p192_p2), %vm3728_vm2, %v3729_v5  ;;  %3429 = vmatprep.mubr.msk.f32.mxu1 (!%p192_p2), %vm3728_vm2, %v3729_v5  ;;  %p223_p3 = scmp.lt.s32.totalorder (!%p192_p2), %s222_s24, 5  ;;  %v3620_v8 = vpack.c.bf16 (!%p192_p2), %v242_v7, %v241_v6  ;;  %v355_v12 = vld [vmem:[%s4059_s3] sm:$0x1] (!%p192_p2)  ;;  %v3929_v54 = vshrl.u32 (!%p192_p2), %v1715_v52, 7  ;;  %vm1770_vm7 = vcmask (!%p192_p2), 1042434   ;;  %vm1773_vm8 = vcmask (!%p192_p2), 59392  }
   0x8   : > { %3618 = vmatpush3.bf16.xpose.msk.msra.mxu0 (!%p192_p2), %vm3779_vm1, %v3616_v3  ;;  %3625 = vmatpush3.bf16.xpose.msk.msra.mxu1 (!%p192_p2), %vm3779_vm1, %v3616_v3  ;;  %v357_v13 = vsel (!%p192_p2), %vm250_vm0, %v355_v12, 0  ;;  %v3329_v14 = vld [vmem:[%s4058_s2] ss:$0 sm:$0xff] (!%p192_p2)  ;;  %p228_p4 = scmp.lt.s32.totalorder (!%p192_p2), %s3767_s19, 1  ;;  %vm1862_vm9 = vcmask (!%p192_p2), 64512   ;;  %vm3231_vm10 = vcmask (!%p192_p2), 256000  }
   0x9   : > { %3619 = vmatprep.subr.bf16.mxu0 (!%p192_p2), %v3727_v2  ;;  %3624 = vmatprep.subr.bf16.mxu1 (!%p192_p2), %v3727_v2  ;;  %v3832_v17 = vand.u32 (!%p192_p2), 4294901760, %v357_v13  ;;  %v3932_v55 = vsub.s32 (!%p192_p2), 0, %v3929_v54 }
   0xa   : > { %3699 = vset.pattern.permute.xlu1 (!%p192_p2), %v3730_v53  ;;  %3700 = vset.pattern.permute.xlu0 (!%p192_p2), %v3730_v53 }
   0xb   : > { %v3835_v22 = vsub.f32 (!%p192_p2), %v357_v13, %v3832_v17 }
   0xd   : > { %s4065_s24 = smov (!%p223_p3, %s222_s24), 5  ;;  %v3838_v25 = vand.u32 4294901760, %v3835_v22  ;;  %s4067_s19 = smov (!%p228_p4, %s3767_s19), 1 }
   0xe   : > { %s3326_s29 = sshll.u32 %s4065_s24, 3  ;;  %s3327_s12 = sshll.u32 %s4067_s19, 2 }
   0xf   : > { %s226_s7 = scalar_lea.vmem %s4056_s0, %s3326_s29  ;;  %v431_v26 = vsub.f32 %v3835_v22, %v3838_v25  ;;  %s235_s15 = scalar_lea.vmem %s4061_s5, %s3327_s12 }
  0x10   : > { %3622 = vmatpush3.bf16.xpose.msk.msra.mxu0 %vm3779_vm1, %v3620_v8  ;;  %3626 = vmatpush3.bf16.xpose.msk.msra.mxu1 %vm3779_vm1, %v3620_v8  ;;  %v3807_v9 = vld [vmem:[%s226_s7] sm:$0xff]  ;;  %v3809_v10 = vld [vmem:[%s226_s7 + $0x8] sm:$0xff]  ;;  %v3817_v11 = vld [vmem:[%s226_s7 + $0x10] sm:$0xff]  ;;  %s231_s20 = scalar_lea.vmem %s4060_s4, %s3327_s12 }
  0x11   : > { %3435 = vmatprep.subr.mxu1 %v3729_v5  ;;  %3465 = vmatprep.subr.mxu0 %v3729_v5  ;;  %v3844_v32 = vand.u32 4294901760, %v431_v26  ;;  %v3890_v49 = vand.u32 4294901760, %v3807_v9  ;;  %v3922_v51 = vand.u32 4294901760, %v3809_v10  ;;  %vm1709_vm3 = vcmp.ne.f32.partialorder %v3807_v9, 0.0 }
  0x12   : > { %vm1710_vm4 = vcmp.ne.f32.partialorder %v3809_v10, 0.0  ;;  %vm1711_vm5 = vcmp.ne.f32.partialorder %v3817_v11, 0.0  ;;  %v1788_v26 = vsub.s32 2, %v3929_v54 }
  0x17   : > { %3427 = vmatmul.mubr.msk.f32.vlgmr.msra.gmra.mrb[0].mxu0 %vm250_vm0, %v3807_v9  ;;  %3430 = vmatmul.mubr.msk.f32.vlgmr.msra.gmra.mrb[0].mxu1 %vm250_vm0, %v3809_v10 }
  0x18   : > { %3432 = vmatprep.mubr.msk.f32.mxu1 %vm3728_vm2, %v3729_v5  ;;  %3467 = vmatprep.mubr.msk.f32.mxu0 %vm3728_vm2, %v3729_v5 }
  0x1b   : > { %3433 = vmatmul.mubr.msk.f32.gmra.mrb[2].mxu1 %vm250_vm0, %v3817_v11 }
  0x1c   : > { %3437 = vmatprep.mubr.msk.f32.mxu1 %vm3728_vm2, %v3729_v5 }
  0xea   : > { %v338_v15 = vpop.f32.mrb[0].mxu0  ;;  %v343_v16 = vpop.f32.mrb[0].mxu1 }
  0xeb   : > { %v339_v18 = vadd.f32 %v3329_v14, %v338_v15  ;;  %v3428_v19 = vpop.f32.mrb[1].mxu0  ;;  %v344_v20 = vadd.f32 %v3329_v14, %v343_v16  ;;  %v3431_v21 = vpop.f32.mrb[1].mxu1 }
  0xed   : > { %3701 = vtanh.f32 %v339_v18 }
  0xee   : > { %3703 = vtanh.f32 %v344_v20  ;;  %v348_v23 = vpop.f32.mrb[2].mxu1 }
  0xef   : > { %v3434_v24 = vpop.f32.mrb[3].mxu1  ;;  %v349_v42 = vadd.f32 %v3329_v14, %v348_v23  ;;  %v1755_v14 = vand.u32 127, %v1715_v52 }
  0xf1   : > { %3705 = vtanh.f32 %v349_v42  ;;  %v3941_v16 = vsub.s32 %v1755_v14, %v3929_v54 }
  0xf7   : > { %v3702_v27 = vpop.eup %3701 }
  0xf8   : > { %v3704_v28 = vpop.eup %3703  ;;  %v360_v29 = vsel %vm250_vm0, %v3702_v27, 0 }
  0xf9   : > { %v363_v30 = vand.u32 4294901760, %v360_v29  ;;  %v809_v31 = vsel %vm250_vm0, %v3704_v28, 0 }
  0xfa   : > { %v812_v33 = vand.u32 4294901760, %v809_v31 }
  0xfb   : > { %3436 = vmatpush3.xpose.msra.mxu1 %v363_v30  ;;  %v440_v34 = vsub.f32 %v360_v29, %v363_v30  ;;  %v3706_v43 = vpop.eup %3705 }
  0xfc   : > { %3466 = vmatpush3.xpose.msra.mxu0 %v812_v33  ;;  %v889_v35 = vsub.f32 %v809_v31, %v812_v33  ;;  %3440 = vmatprep.subr.mxu1 %v3729_v5  ;;  %v1258_v44 = vsel %vm250_vm0, %v3706_v43, 0 }
  0xfd   : > { %v441_v36 = vand.u32 4294901760, %v440_v34  ;;  %3470 = vmatprep.subr.mxu0 %v3729_v5  ;;  %v1261_v45 = vand.u32 4294901760, %v1258_v44 }
  0xfe   : > { %3438 = vmatmul.mubr.f32.vlgmr.msra.gmra.mrb[4].mxu1 %v3844_v32  ;;  %v890_v37 = vand.u32 4294901760, %v889_v35 }
  0xff   : > { %3468 = vmatmul.mubr.f32.vlgmr.msra.gmra.mrb[2].mxu0 %v3844_v32  ;;  %v442_v38 = vsub.f32 %v440_v34, %v441_v36  ;;  %3442 = vmatprep.mubr.msk.f32.mxu1 %vm3728_vm2, %v3729_v5  ;;  %v1338_v46 = vsub.f32 %v1258_v44, %v1261_v45 }
 0x100   : > { %v891_v39 = vsub.f32 %v889_v35, %v890_v37  ;;  %3472 = vmatprep.mubr.msk.f32.mxu0 %vm3728_vm2, %v3729_v5 }
 0x101   : > { %v443_v40 = vand.u32 4294901760, %v442_v38  ;;  %v1339_v47 = vand.u32 4294901760, %v1338_v46 }
 0x102   : > { %v892_v41 = vand.u32 4294901760, %v891_v39 }
 0x103   : > { %3441 = vmatpush3.xpose.msra.mxu1 %v443_v40  ;;  %v1340_v48 = vsub.f32 %v1338_v46, %v1339_v47 }
 0x104   : > { %3445 = vmatprep.subr.mxu1 %v3729_v5  ;;  %3471 = vmatpush3.xpose.msra.mxu0 %v892_v41 }
 0x105   : > { %3475 = vmatprep.subr.mxu0 %v3729_v5  ;;  %v1341_v50 = vand.u32 4294901760, %v1340_v48 }
 0x106   : > { %3443 = vmatmul.mubr.f32.vlgmr.msra.gmra.mrb[4].mxu1 %v3832_v17 }
 0x107   : > { %3446 = vmatpush3.xpose.msra.mxu1 %v440_v34  ;;  %3473 = vmatmul.mubr.f32.vlgmr.msra.gmra.mrb[2].mxu0 %v3832_v17 }
 0x108   : > { %3447 = vmatprep.mubr.msk.f32.mxu1 %vm3728_vm2, %v3729_v5  ;;  %3450 = vmatprep.subr.mxu1 %v3729_v5 }
 0x109   : > { %3476 = vmatpush3.xpose.msra.mxu0 %v889_v35  ;;  %3477 = vmatprep.mubr.msk.f32.mxu0 %vm3728_vm2, %v3729_v5 }
 0x10a   : > { %3480 = vmatprep.subr.mxu0 %v3729_v5 }
 0x10e   : > { %3448 = vmatmul.mubr.f32.vlgmr.msra.gmra.mrb[4].mxu1 %v3835_v22 }
 0x10f   : > { %3451 = vmatpush3.xpose.msra.mxu1 %v363_v30  ;;  %3478 = vmatmul.mubr.f32.vlgmr.msra.gmra.mrb[2].mxu0 %v3835_v22 }
 0x110   : > { %3452 = vmatprep.mubr.msk.f32.mxu1 %vm3728_vm2, %v3729_v5  ;;  %3455 = vmatprep.subr.mxu1 %v3729_v5 }
 0x111   : > { %3481 = vmatpush3.xpose.msra.mxu0 %v812_v33  ;;  %3482 = vmatprep.mubr.msk.f32.mxu0 %vm3728_vm2, %v3729_v5 }
 0x112   : > { %3485 = vmatprep.subr.mxu0 %v3729_v5 }
 0x116   : > { %3453 = vmatmul.mubr.f32.vlgmr.msra.gmra.mrb[4].mxu1 %v3838_v25 }
 0x117   : > { %3456 = vmatpush3.xpose.msra.mxu1 %v441_v36  ;;  %3483 = vmatmul.mubr.f32.vlgmr.msra.gmra.mrb[2].mxu0 %v3838_v25 }
 0x118   : > { %3457 = vmatprep.mubr.msk.f32.mxu1 %vm3728_vm2, %v3729_v5  ;;  %3460 = vmatprep.subr.mxu1 %v3729_v5 }
 0x119   : > { %3486 = vmatpush3.xpose.msra.mxu0 %v890_v37  ;;  %3487 = vmatprep.mubr.msk.f32.mxu0 %vm3728_vm2, %v3729_v5 }
 0x11a   : > { %3490 = vmatprep.subr.mxu0 %v3729_v5 }
 0x11e   : > { %3458 = vmatmul.mubr.f32.vlgmr.msra.gmra.mrb[4].mxu1 %v3832_v17 }
 0x11f   : > { %3461 = vmatpush3.xpose.msra.mxu1 %v363_v30  ;;  %3488 = vmatmul.mubr.f32.vlgmr.msra.gmra.mrb[2].mxu0 %v3832_v17 }
 0x120   : > { %3491 = vmatpush3.xpose.msra.mxu0 %v812_v33  ;;  %3462 = vmatprep.mubr.msk.f32.mxu1 %vm3728_vm2, %v3729_v5 }
 0x121   : > { %3495 = vmatprep.subr.mxu1 %v3729_v5  ;;  %3492 = vmatprep.mubr.msk.f32.mxu0 %vm3728_vm2, %v3729_v5 }
 0x122   : > { %3525 = vmatprep.subr.mxu0 %v3729_v5 }
 0x126   : > { %3463 = vmatmul.mubr.f32.vlgmr.msra.gmra.mrb[4].mxu1 %v3832_v17 }
 0x127   : > { %3496 = vmatpush3.xpose.msra.mxu1 %v1261_v45  ;;  %3497 = vmatprep.mubr.msk.f32.mxu1 %vm3728_vm2, %v3729_v5 }
 0x128   : > { %3493 = vmatmul.mubr.f32.vlgmr.msra.gmra.mrb[2].mxu0 %v3832_v17  ;;  %3500 = vmatprep.subr.mxu1 %v3729_v5 }
 0x129   : > { %3526 = vmatpush3.msra.mxu0 %v3890_v49  ;;  %3527 = vmatprep.mubr.msk.f32.mxu0 %vm3728_vm2, %v3729_v5 }
 0x12a   : > { %3498 = vmatmul.mubr.f32.vlgmr.msra.gmra.mrb[6].mxu1 %v3844_v32  ;;  %3530 = vmatprep.subr.mxu0 %v3729_v5 }
 0x12b   : > { %3501 = vmatpush3.xpose.msra.mxu1 %v1341_v50  ;;  %3502 = vmatprep.mubr.msk.f32.mxu1 %vm3728_vm2, %v3729_v5 }
 0x12c   : > { %3505 = vmatprep.subr.mxu1 %v3729_v5 }
 0x132   : > { %3503 = vmatmul.mubr.f32.vlgmr.msra.gmra.mrb[6].mxu1 %v3832_v17 }
 0x133   : > { %3506 = vmatpush3.xpose.msra.mxu1 %v1338_v46  ;;  %3507 = vmatprep.mubr.msk.f32.mxu1 %vm3728_vm2, %v3729_v5 }
 0x134   : > { %3510 = vmatprep.subr.mxu1 %v3729_v5 }
 0x13a   : > { %3508 = vmatmul.mubr.f32.vlgmr.msra.gmra.mrb[6].mxu1 %v3835_v22 }
 0x13b   : > { %3511 = vmatpush3.xpose.msra.mxu1 %v1261_v45  ;;  %3512 = vmatprep.mubr.msk.f32.mxu1 %vm3728_vm2, %v3729_v5 }
 0x13c   : > { %3515 = vmatprep.subr.mxu1 %v3729_v5 }
 0x142   : > { %3513 = vmatmul.mubr.f32.vlgmr.msra.gmra.mrb[6].mxu1 %v3838_v25  ;;  %v1784_v25 = vsub.s32 1, %v3929_v54 }
 0x143   : > { %3516 = vmatpush3.xpose.msra.mxu1 %v1339_v47  ;;  %3517 = vmatprep.mubr.msk.f32.mxu1 %vm3728_vm2, %v3729_v5 }
 0x144   : > { %3520 = vmatprep.subr.mxu1 %v3729_v5 }
 0x14a   : > { %3518 = vmatmul.mubr.f32.vlgmr.msra.gmra.mrb[6].mxu1 %v3832_v17 }
 0x14b   : > { %3521 = vmatpush3.xpose.msra.mxu1 %v1261_v45  ;;  %3522 = vmatprep.mubr.msk.f32.mxu1 %vm3728_vm2, %v3729_v5 }
 0x14c   : > { %3555 = vmatprep.subr.mxu1 %v3729_v5 }
 0x152   : > { %3523 = vmatmul.mubr.f32.vlgmr.msra.gmra.mrb[6].mxu1 %v3832_v17 }
 0x153   : > { %3556 = vmatpush3.msra.mxu1 %v3922_v51  ;;  %3557 = vmatprep.mubr.msk.f32.mxu1 %vm3728_vm2, %v3729_v5 }
 0x154   : > { %3560 = vmatprep.subr.mxu1 %v3729_v5 }
 0x1f9   : > { %v804_v56 = vpop.f32.mrb[4].mxu1 }
 0x1fa   : > { %v1706_v57 = vmul.f32 0.17677669, %v804_v56  ;;  %v3464_v58 = vpop.f32.mrb[5].mxu1 }
 0x1fb   : > { %v1253_v59 = vpop.f32.mrb[2].mxu0 }
 0x1fc   : > { %v1707_v60 = vmul.f32 0.17677669, %v1253_v59  ;;  %v1718_v61 = vrot.slane %v1706_v57, %v3932_v55  ;;  %v3494_v62 = vpop.f32.mrb[3].mxu0 }
 0x1fd   : > { %v2399_v62 = vsub.f32 %v3809_v10, %v3922_v51 }
 0x1fe   : > { %1720 = vbcast.lane.b32.xlu0 %v1718_v61, 256  ;;  %v1725_v63 = vrot.slane %v1707_v60, %v3932_v55 }
 0x202   : > { %1727 = vbcast.lane.b32.xlu0 %v1725_v63, 256 }
 0x225   : > { %v1702_v0 = vpop.f32.mrb[6].mxu1 }
 0x226   : > { %v1708_v1 = vmul.f32 0.17677669, %v1702_v0  ;;  %v3524_v2 = vpop.f32.mrb[7].mxu1 }
 0x228   : > { %v1732_v3 = vrot.slane %v1708_v1, %v3932_v55 }
 0x22a   : > { %1734 = vbcast.lane.b32.xlu1 %v1732_v3, 256 }
 0x270   : > { %v1721_v4 = vpop.permute.xlu0 %1720 }
 0x271   : > { %v1739_v6 = vsel %vm1709_vm3, %v1721_v4, -1e+32 }
 0x272   : > { %1746 = vperm.xlu1 %3699, %v1739_v6  }
 0x274   : > { %v1728_v7 = vpop.permute.xlu0 %1727 }
 0x275   : > { %v1740_v8 = vsel %vm1710_vm4, %v1728_v7, -1e+32 }
 0x276   : > { %1749 = vperm.xlu0 %3700, %v1740_v8  }
 0x29c   : > { %v1735_v12 = vpop.permute.xlu1 %1734 }
 0x29d   : > { %v1741_v13 = vsel %vm1711_vm5, %v1735_v12, -1e+32 }
 0x29e   : > { %1752 = vperm.xlu1 %3699, %v1741_v13  }
 0x2f1   : > { %v1747_v17 = vpop.permute.xlu1 %1746 }
 0x2f2   : > { %v1759_v19 = vrot.slane %v1747_v17, %v3941_v16 }
 0x2f5   : > { %v1750_v15 = vpop.permute.xlu0 %1749 }
 0x2f6   : > { %v1763_v18 = vrot.slane %v1750_v15, %v3941_v16 }
 0x2f8   : > { %v1769_v22 = vsel %vm1768_vm6, %v1763_v18, %v1759_v19 }
 0x31d   : > { %v1753_v20 = vpop.permute.xlu1 %1752 }
 0x31e   : > { %v1767_v21 = vrot.slane %v1753_v20, %v3941_v16 }
 0x320   : > { %v1771_v23 = vsel %vm1770_vm7, %v1767_v21, %v1769_v22 }
 0x321   : > { %v1774_v24 = vsel %vm1773_vm8, %v1771_v23, -inf }
 0x322   : > { %1775 = vmax.xlane.f32.xlu1 %v1774_v24 }
 0x3af   : > { %v1776_v27 = vpop.xlane.xlu1 %1775 }
 0x3b0   : > { %v1781_v28 = vrot.slane %v1776_v27, %v3932_v55  ;;  %v1785_v29 = vrot.slane %v1776_v27, %v1784_v25  ;;  %v1789_v30 = vrot.slane %v1776_v27, %v1788_v26 }
 0x3b2   : > { %v1793_v31 = vsub.f32 %v1739_v6, %v1781_v28  ;;  %v1794_v32 = vsub.f32 %v1740_v8, %v1785_v29  ;;  %v1795_v34 = vsub.f32 %v1741_v13, %v1789_v30  ;;  %v2778_v28 = vand.u32 4294901760, %v3817_v11 }
 0x3b4   : > { %v1796_v33 = vmul.f32 1.442695, %v1793_v31  ;;  %v1798_v35 = vmul.f32 1.442695, %v1794_v32  ;;  %v1800_v36 = vmul.f32 1.442695, %v1795_v34  ;;  %v2855_v30 = vsub.f32 %v3817_v11, %v2778_v28 }
 0x3b6   : > { %3707 = vpow2.f32 %v1796_v33  ;;  %v2856_v32 = vand.u32 4294901760, %v2855_v30 }
 0x3b7   : > { %3709 = vpow2.f32 %v1798_v35 }
 0x3b8   : > { %3711 = vpow2.f32 %v1800_v36  ;;  %v2857_v11 = vsub.f32 %v2855_v30, %v2856_v32 }
 0x3c0   : > { %v3708_v37 = vpop.eup %3707 }
 0x3c1   : > { %1806 = vperm.xlu0 %3700, %v3708_v37   ;;  %v3710_v38 = vpop.eup %3709 }
 0x3c2   : > { %v3712_v39 = vpop.eup %3711 }
 0x3c5   : > { %1809 = vperm.xlu0 %3700, %v3710_v38  }
 0x3c9   : > { %1812 = vperm.xlu0 %3700, %v3712_v39  }
 0x440   : > { %v1807_v40 = vpop.permute.xlu0 %1806 }
 0x441   : > { %v1817_v43 = vrot.slane %v1807_v40, %v3941_v16 }
 0x444   : > { %v1810_v41 = vpop.permute.xlu0 %1809 }
 0x445   : > { %v1821_v42 = vrot.slane %v1810_v41, %v3941_v16 }
 0x447   : > { %v1826_v46 = vsel %vm1768_vm6, %v1821_v42, %v1817_v43 }
 0x448   : > { %v1813_v44 = vpop.permute.xlu0 %1812 }
 0x449   : > { %v1825_v45 = vrot.slane %v1813_v44, %v3941_v16 }
 0x44b   : > { %v1827_v47 = vsel %vm1770_vm7, %v1825_v45, %v1826_v46 }
 0x44c   : > { %v1829_v48 = vsel %vm1773_vm8, %v1827_v47, 0.0 }
 0x44d   : > { %1830 = vadd.xlane.f32.xlu0 %v1829_v48 }
 0x4da   : > { %v1831_v50 = vpop.xlane.xlu0 %1830 }
 0x4db   : > { %v1836_v52 = vrot.slane %v1831_v50, %v3932_v55  ;;  %v1840_v53 = vrot.slane %v1831_v50, %v1784_v25  ;;  %v1844_v54 = vrot.slane %v1831_v50, %v1788_v26  ;;  %v1943_v55 = vsub.f32 %v3807_v9, %v3890_v49 }
 0x4dc   : > { %v2400_v9 = vand.u32 4294901760, %v2399_v62 }
 0x4dd   : > { %3713 = vrcp.f32 %v1836_v52  ;;  %v1944_v4 = vand.u32 4294901760, %v1943_v55 }
 0x4de   : > { %3715 = vrcp.f32 %v1840_v53  ;;  %v2401_v20 = vsub.f32 %v2399_v62, %v2400_v9 }
 0x4df   : > { %3717 = vrcp.f32 %v1844_v54  ;;  %v1945_v18 = vsub.f32 %v1943_v55, %v1944_v4 }
 0x4e0   : > { %v2402_v26 = vand.u32 4294901760, %v2401_v20 }
 0x4e1   : > { %v1946_v24 = vand.u32 4294901760, %v1945_v18 }
 0x4e7   : > { %v3714_v56 = vpop.eup %3713 }
 0x4e8   : > { %v3716_v57 = vpop.eup %3715  ;;  %v1849_v58 = vmul.f32 %v3714_v56, %v3708_v37 }
 0x4e9   : > { %v3718_v59 = vpop.eup %3717  ;;  %v1851_v60 = vmul.f32 %v3716_v57, %v3710_v38 }
 0x4ea   : > { %1856 = vperm.xlu1 %3699, %v1849_v58   ;;  %v1853_v61 = vmul.f32 %v3718_v59, %v3712_v39 }
 0x4eb   : > { %2313 = vperm.xlu0 %3700, %v1851_v60  }
 0x4ee   : > { %2769 = vperm.xlu1 %3699, %v1853_v61  }
 0x569   : > { %v1857_v63 = vpop.permute.xlu1 %1856 }
 0x56a   : > { %v2314_v0 = vpop.permute.xlu0 %2313  ;;  %v1861_v1 = vrot.slane %v1857_v63, %v3941_v16 }
 0x56b   : > { %v2318_v2 = vrot.slane %v2314_v0, %v3941_v16 }
 0x56c   : > { %v1863_v3 = vsel %vm1862_vm9, %v1861_v1, 0 }
 0x56d   : > { %v2319_v6 = vsel %vm1862_vm9, %v2318_v2, 0  ;;  %v3972_v7 = vand.u32 4294901760, %v1863_v3  ;;  %v2770_v8 = vpop.permute.xlu1 %2769  ;;  %v3233_v14 = vsel %vm1768_vm6, %v2318_v2, %v1861_v1 }
 0x56e   : > { %v3974_v12 = vand.u32 4294901760, %v2319_v6  ;;  %v2774_v10 = vrot.slane %v2770_v8, %v3941_v16 }
 0x56f   : > { %v1932_v13 = vsub.f32 %v1863_v3, %v3972_v7 }
 0x570   : > { %v2388_v15 = vsub.f32 %v2319_v6, %v3974_v12  ;;  %v3234_v17 = vsel %vm1770_vm7, %v2774_v10, %v3233_v14  ;;  %v2775_v27 = vsel %vm1862_vm9, %v2774_v10, 0 }
 0x571   : > { %v1933_v19 = vand.u32 4294901760, %v1932_v13  ;;  %3236 = vst.msk [vmem:[%s235_s15] sm:$0x7] %vm1773_vm8, %v3234_v17  ;;  %v2843_v29 = vand.u32 4294901760, %v2775_v27 }
 0x572   : > { %v2389_v21 = vand.u32 4294901760, %v2388_v15 }
 0x573   : > { %v1934_v22 = vsub.f32 %v1932_v13, %v1933_v19  ;;  %v2844_v31 = vsub.f32 %v2775_v27, %v2843_v29 }
 0x574   : > { %v2390_v23 = vsub.f32 %v2388_v15, %v2389_v21 }
 0x575   : > { %v1935_v25 = vand.u32 4294901760, %v1934_v22  ;;  %v2845_v33 = vand.u32 4294901760, %v2844_v31 }
 0x576   : > { %v2391_v16 = vand.u32 4294901760, %v2390_v23 }
 0x577   : > { %3528 = vmatmul.mubr.f32.vlgmr.msra.gmra.mrb[4].mxu0 %v1935_v25  ;;  %v2846_v34 = vsub.f32 %v2844_v31, %v2845_v33 }
 0x578   : > { %3558 = vmatmul.mubr.f32.vlgmr.msra.gmra.mrb[8].mxu1 %v2391_v16  ;;  %3531 = vmatpush3.msra.mxu0 %v1946_v24 }
 0x579   : > { %3532 = vmatprep.mubr.msk.f32.mxu0 %vm3728_vm2, %v3729_v5  ;;  %3561 = vmatpush3.msra.mxu1 %v2402_v26  ;;  %v2847_v35 = vand.u32 4294901760, %v2846_v34 }
 0x57a   : > { %3562 = vmatprep.mubr.msk.f32.mxu1 %vm3728_vm2, %v3729_v5  ;;  %3535 = vmatprep.subr.mxu0 %v3729_v5 }
 0x57b   : > { %3565 = vmatprep.subr.mxu1 %v3729_v5 }
 0x57f   : > { %3533 = vmatmul.mubr.f32.vlgmr.msra.gmra.mrb[4].mxu0 %v3972_v7 }
 0x580   : > { %3563 = vmatmul.mubr.f32.vlgmr.msra.gmra.mrb[8].mxu1 %v3974_v12  ;;  %3536 = vmatpush3.msra.mxu0 %v1943_v55 }
 0x581   : > { %3537 = vmatprep.mubr.msk.f32.mxu0 %vm3728_vm2, %v3729_v5  ;;  %3566 = vmatpush3.msra.mxu1 %v2399_v62 }
 0x582   : > { %3567 = vmatprep.mubr.msk.f32.mxu1 %vm3728_vm2, %v3729_v5  ;;  %3540 = vmatprep.subr.mxu0 %v3729_v5 }
 0x583   : > { %3570 = vmatprep.subr.mxu1 %v3729_v5 }
 0x587   : > { %3538 = vmatmul.mubr.f32.vlgmr.msra.gmra.mrb[4].mxu0 %v1932_v13 }
 0x588   : > { %3568 = vmatmul.mubr.f32.vlgmr.msra.gmra.mrb[8].mxu1 %v2388_v15  ;;  %3541 = vmatpush3.msra.mxu0 %v3890_v49 }
 0x589   : > { %3542 = vmatprep.mubr.msk.f32.mxu0 %vm3728_vm2, %v3729_v5  ;;  %3571 = vmatpush3.msra.mxu1 %v3922_v51 }
 0x58a   : > { %3572 = vmatprep.mubr.msk.f32.mxu1 %vm3728_vm2, %v3729_v5  ;;  %3545 = vmatprep.subr.mxu0 %v3729_v5 }
 0x58b   : > { %3575 = vmatprep.subr.mxu1 %v3729_v5 }
 0x58f   : > { %3543 = vmatmul.mubr.f32.vlgmr.msra.gmra.mrb[4].mxu0 %v1933_v19 }
 0x590   : > { %3573 = vmatmul.mubr.f32.vlgmr.msra.gmra.mrb[8].mxu1 %v2389_v21  ;;  %3546 = vmatpush3.msra.mxu0 %v1944_v4 }
 0x591   : > { %3547 = vmatprep.mubr.msk.f32.mxu0 %vm3728_vm2, %v3729_v5  ;;  %3576 = vmatpush3.msra.mxu1 %v2400_v9 }
 0x592   : > { %3577 = vmatprep.mubr.msk.f32.mxu1 %vm3728_vm2, %v3729_v5  ;;  %3550 = vmatprep.subr.mxu0 %v3729_v5 }
 0x593   : > { %3580 = vmatprep.subr.mxu1 %v3729_v5 }
 0x597   : > { %3548 = vmatmul.mubr.f32.vlgmr.msra.gmra.mrb[4].mxu0 %v3972_v7 }
 0x598   : > { %3578 = vmatmul.mubr.f32.vlgmr.msra.gmra.mrb[8].mxu1 %v3974_v12  ;;  %3551 = vmatpush3.msra.mxu0 %v3890_v49  ;;  %v2858_v49 = vand.u32 4294901760, %v2857_v11 }
 0x599   : > { %3552 = vmatprep.mubr.msk.f32.mxu0 %vm3728_vm2, %v3729_v5  ;;  %3581 = vmatpush3.msra.mxu1 %v3922_v51 }
 0x59a   : > { %3582 = vmatprep.mubr.msk.f32.mxu1 %vm3728_vm2, %v3729_v5  ;;  %3585 = vmatprep.subr.mxu0 %v3729_v5 }
 0x59f   : > { %3553 = vmatmul.mubr.f32.vlgmr.msra.gmra.mrb[4].mxu0 %v3972_v7 }
 0x5a0   : > { %3583 = vmatmul.mubr.f32.vlgmr.msra.gmra.mrb[8].mxu1 %v3974_v12  ;;  %3586 = vmatpush3.msra.mxu0 %v2778_v28 }
 0x5a1   : > { %3587 = vmatprep.mubr.msk.f32.mxu0 %vm3728_vm2, %v3729_v5  ;;  %3590 = vmatprep.subr.mxu0 %v3729_v5 }
 0x5a3   : > { %3588 = vmatmul.mubr.f32.vlgmr.msra.gmra.mrb[6].mxu0 %v2847_v35 }
 0x5a4   : > { %3591 = vmatpush3.msra.mxu0 %v2858_v49  ;;  %3592 = vmatprep.mubr.msk.f32.mxu0 %vm3728_vm2, %v3729_v5 }
 0x5a5   : > { %3595 = vmatprep.subr.mxu0 %v3729_v5 }
 0x5ab   : > { %3593 = vmatmul.mubr.f32.vlgmr.msra.gmra.mrb[6].mxu0 %v2843_v29 }
 0x5ac   : > { %3596 = vmatpush3.msra.mxu0 %v2855_v30  ;;  %3597 = vmatprep.mubr.msk.f32.mxu0 %vm3728_vm2, %v3729_v5 }
 0x5ad   : > { %3600 = vmatprep.subr.mxu0 %v3729_v5 }
 0x5b3   : > { %3598 = vmatmul.mubr.f32.vlgmr.msra.gmra.mrb[6].mxu0 %v2844_v31 }
 0x5b4   : > { %3601 = vmatpush3.msra.mxu0 %v2778_v28  ;;  %3602 = vmatprep.mubr.msk.f32.mxu0 %vm3728_vm2, %v3729_v5 }
 0x5b5   : > { %3605 = vmatprep.subr.mxu0 %v3729_v5 }
 0x5bb   : > { %3603 = vmatmul.mubr.f32.vlgmr.msra.gmra.mrb[6].mxu0 %v2845_v33 }
 0x5bc   : > { %3606 = vmatpush3.msra.mxu0 %v2856_v32  ;;  %3607 = vmatprep.mubr.msk.f32.mxu0 %vm3728_vm2, %v3729_v5 }
 0x5bd   : > { %3610 = vmatprep.subr.mxu0 %v3729_v5 }
 0x5c3   : > { %3608 = vmatmul.mubr.f32.vlgmr.msra.gmra.mrb[6].mxu0 %v2843_v29 }
 0x5c4   : > { %3611 = vmatpush3.msra.mxu0 %v2778_v28  ;;  %3612 = vmatprep.mubr.msk.f32.mxu0 %vm3728_vm2, %v3729_v5 }
 0x5cb   : > { %3613 = vmatmul.mubr.f32.vlgmr.msra.gmra.mrb[6].mxu0 %v2843_v29 }
 0x672   : > { %v2307_v51 = vpop.f32.mrb[4].mxu0 }
 0x673   : > { %v2763_v36 = vpop.f32.mrb[8].mxu1  ;;  %v3554_v37 = vpop.f32.mrb[5].mxu0 }
 0x674   : > { %v3226_v38 = vrot.slane %v2763_v36, 7  ;;  %v3584_v39 = vpop.f32.mrb[9].mxu1 }
 0x676   : > { %v3227_v40 = vsel %vm1768_vm6, %v3226_v38, %v2307_v51 }
 0x69e   : > { %v3219_v41 = vpop.f32.mrb[6].mxu0 }
 0x69f   : > { %v3228_v42 = vrot.slane %v3219_v41, 6  ;;  %v3614_v43 = vpop.f32.mrb[7].mxu0 }
 0x6a1   : > { %v3229_v44 = vsel %vm1770_vm7, %v3228_v42, %v3227_v40 }
 0x6a2   : > { %3232 = vst.msk [vmem:[%s231_s20] sm:$0x7] %vm3231_vm10, %v3229_v44 }
 0x6a3 PF: > { %s16_s18 = sadd.s32 1, %s3725_s18  }
 0x6a4   : > { %p13_p5 = scmp.ge.s32.totalorder %s16_s18, 4  }
 0x6a6   :  { %15 = sbr.rel (!%p13_p5) target bundleno = 1 (0x1), region = 78 }

</bundles_post_ra>
